<compile_context>
chip_gen: v5e
topology: v5e:2x2
jax: 0.10.0
libtpu: 0.0.40
codegen_flags: <defaults>
</compile_context>

<pallas_src>
import functools

import jax
import jax.numpy as jnp
from jax import lax
from jax.experimental import pallas as pl
from jax.experimental.pallas import tpu as pltpu

LANES = 128
SUBLANES = 8
DEFAULT_MAX_TILE_ROWS = 2048   # 1 MiB pred + 2 MiB y per step (f32); ~6 MiB
                               # double-buffered -> safe on v5e/v6e/v7x defaults.
_PALLAS_MIN_N = 4096           # TODO(synk): re-benchmark crossover on HW now
                               # that the host-side prep copies are gone.


def _round_up(a, b):
    return -(-a // b) * b


def _cdiv(a, b):
    return -(-a // b)


def _sq_hinge_kernel(n_ref, margin_ref, pred_ref, yt_ref, out_ref, *,
                     tile_rows, chunk):
    """One grid step: fold sum(loss^2) of a (tile_rows, 128) tile into the
    per-split (1, 8, 128) output accumulator block."""
    t = pl.program_id(1)

    @pl.when(t == 0)
    def _init():
        out_ref[...] = jnp.zeros_like(out_ref)

    n_valid = n_ref[0]          # runtime element count (SMEM, int32)
    margin = margin_ref[0]      # runtime margin (SMEM, float32)

    # Logical tile index (NOT the clamped one used for the DMA): clamped /
    # ragged grid steps are fully masked below and contribute exactly 0.
    tile_idx = pl.program_id(0) * pl.num_programs(1) + t
    base = tile_idx * (tile_rows * LANES)   # flat element offset of this tile

    # Chunk-local flat index; hoisted out of the loop (pure VPU).
    local_idx = (lax.broadcasted_iota(jnp.int32, (chunk, LANES), 0) * LANES
                 + lax.broadcasted_iota(jnp.int32, (chunk, LANES), 1))

    n_chunks = tile_rows // chunk

    def body(i, acc):
        r0 = pl.multiple_of(i * chunk, chunk)
        pred = pred_ref[pl.ds(r0, chunk), :].astype(jnp.float32)
        low = yt_ref[0, pl.ds(r0, chunk), :].astype(jnp.float32)
        high = yt_ref[1, pl.ds(r0, chunk), :].astype(jnp.float32)

        loss = (jnp.maximum(low - pred + margin, 0.0)
                + jnp.maximum(pred - high + margin, 0.0))
        sq = loss * loss

        # Mask the ragged tail (array padding + clamped out-of-range steps).
        idx = base + r0 * LANES + local_idx
        sq = jnp.where(idx < n_valid, sq, 0.0)

        # Fold (chunk, 128) -> (8, 128) with plain VPU adds; tile-aligned
        # reshape, everything stays in vregs.
        return acc + jnp.sum(sq.reshape(chunk // SUBLANES, SUBLANES, LANES),
                             axis=0)

    acc = lax.fori_loop(0, n_chunks, body,
                        jnp.zeros((SUBLANES, LANES), jnp.float32),
                        unroll=min(8, n_chunks))
    out_ref[0] += acc


def _reference(predicted, y, margin=0.0):
    low, high = y[:, 0:1], y[:, 1:2]
    loss = (jnp.maximum(low - predicted + margin, 0.0)
            + jnp.maximum(predicted - high + margin, 0.0))
    return jnp.mean(jnp.square(loss))


@functools.partial(jax.jit,
                   static_argnames=("use_pallas", "max_tile_rows", "num_splits"))
def squared_hinge_loss(predicted, y, margin=0.0, *, use_pallas=None,
                       max_tile_rows=DEFAULT_MAX_TILE_ROWS, num_splits=2):
    """predicted: (N, 1), y: (N, 2) = [low, high]. Returns scalar f32."""
    N = predicted.shape[0]
    if use_pallas is None:
        use_pallas = N >= _PALLAS_MIN_N
    if not use_pallas:
        # Tiny problems: the fused XLA elementwise+reduce wins.
        return _reference(predicted, y, margin)

    # ---- minimal host-side prep (fused under jit) --------------------------
    pred_flat = predicted.reshape(-1)          # free view
    yt = jnp.transpose(y)                      # (2, N): the ONE copy of y
    padded_n = max(_round_up(N, LANES), SUBLANES * LANES)
    pad = padded_n - N
    if pad:                                    # only when N % 128 != 0 (or tiny)
        pred_flat = jnp.pad(pred_flat, (0, pad))
        yt = jnp.pad(yt, ((0, 0), (0, pad)))   # fuses with the transpose
    rows = padded_n // LANES
    pred2 = pred_flat.reshape(rows, LANES)     # free view
    yt3 = yt.reshape(2, rows, LANES)           # free view

    # ---- tiling / megacore split -------------------------------------------
    max_tile_rows = max(SUBLANES, (int(max_tile_rows) // SUBLANES) * SUBLANES)
    splits = num_splits if (num_splits > 1 and rows >= num_splits * SUBLANES) else 1
    tile_rows = _round_up(_cdiv(rows, splits), SUBLANES)
    tile_rows = min(tile_rows, max_tile_rows, (rows // SUBLANES) * SUBLANES)
    chunk = SUBLANES
    for c in (64, 56, 48, 40, 32, 24, 16, 8):   # vreg-resident chunk size
        if tile_rows % c == 0:
            chunk = c
            break
    total_tiles = _cdiv(rows, tile_rows)
    tiles_per_split = _cdiv(total_tiles, splits)

    def pred_map(s, t):
        return (jnp.minimum(s * tiles_per_split + t, total_tiles - 1), 0)

    def y_map(s, t):
        return (0, jnp.minimum(s * tiles_per_split + t, total_tiles - 1), 0)

    kernel = functools.partial(_sq_hinge_kernel,
                               tile_rows=tile_rows, chunk=chunk)

    n_arr = jnp.full((1,), N, dtype=jnp.int32)
    m_arr = jnp.asarray(margin, dtype=jnp.float32).reshape(1)

    partials = pl.pallas_call(
        kernel,
        out_shape=jax.ShapeDtypeStruct((splits, SUBLANES, LANES), jnp.float32),
        grid=(splits, tiles_per_split),
        in_specs=[
            pl.BlockSpec(memory_space=pltpu.MemorySpace.SMEM),   # N
            pl.BlockSpec(memory_space=pltpu.MemorySpace.SMEM),   # margin
            pl.BlockSpec((tile_rows, LANES), pred_map),
            pl.BlockSpec((2, tile_rows, LANES), y_map),
        ],
        out_specs=pl.BlockSpec((1, SUBLANES, LANES), lambda s, t: (s, 0, 0)),
        compiler_params=pltpu.CompilerParams(
            dimension_semantics=("parallel", "arbitrary")),
    )(n_arr, m_arr, pred2, yt3)

    # Final cross-lane/split reduction + mean scale: tiny XLA epilogue.
    return jnp.sum(partials) * jnp.float32(1.0 / N)


if __name__ == "__main__":
    def make_inputs(key, n):
        k1, k2, k3 = jax.random.split(key, 3)
        predicted = jax.random.normal(k1, (n, 1), dtype=jnp.float32)
        center = jax.random.normal(k2, (n, 1), dtype=jnp.float32)
        half_width = jnp.abs(jax.random.normal(k3, (n, 1), dtype=jnp.float32)) * 0.5
        # y = [low, high] with low <= high so both hinge branches are exercised.
        y = jnp.concatenate([center - half_width, center + half_width], axis=1)
        return predicted, y

    key = jax.random.PRNGKey(0)
    k_small, k_mid, k_big = jax.random.split(key, 3)

    # 1) tiny batch (module's usage scale), forced through the kernel.
    pred_s, y_s = make_inputs(k_small, 8)
    out = jax.block_until_ready(
        squared_hinge_loss(pred_s, y_s, margin=0.0, use_pallas=True))
    ref = _reference(pred_s, y_s, margin=0.0)
    assert jnp.allclose(out, ref, rtol=1e-5, atol=1e-6), (out, ref)

    # 2) N not a multiple of 128, margin > 0, tiny tiles: exercises the masked
    #    ragged tail, the 2-way split, and the clamped out-of-range grid step.
    pred_m, y_m = make_inputs(k_mid, 3000)
    out = jax.block_until_ready(
        squared_hinge_loss(pred_m, y_m, margin=0.25, use_pallas=True,
                           max_tile_rows=8))
    ref = _reference(pred_m, y_m, margin=0.25)
    assert jnp.allclose(out, ref, rtol=1e-5, atol=1e-6), (out, ref)

    # 2b) same shapes, different margin: runtime-scalar margin (no recompile).
    out = jax.block_until_ready(
        squared_hinge_loss(pred_m, y_m, margin=0.5, use_pallas=True,
                           max_tile_rows=8))
    ref = _reference(pred_m, y_m, margin=0.5)
    assert jnp.allclose(out, ref, rtol=1e-5, atol=1e-6), (out, ref)

    # 3) moderate N, default tiling: multi-chunk inner loop + ragged last tile.
    pred_b, y_b = make_inputs(k_big, 40000)
    out = jax.block_until_ready(
        squared_hinge_loss(pred_b, y_b, margin=0.1, use_pallas=True))
    ref = _reference(pred_b, y_b, margin=0.1)
    assert jnp.allclose(out, ref, rtol=1e-5, atol=1e-5), (out, ref)

    # 4) auto-dispatch path (tiny N -> fused XLA reference).
    out = jax.block_until_ready(squared_hinge_loss(pred_s, y_s, margin=0.1))
    ref = _reference(pred_s, y_s, margin=0.1)
    assert jnp.allclose(out, ref, rtol=1e-5, atol=1e-6), (out, ref)

    print("KERNEL_OK")
</pallas_src>

<mosaic_0001>
module attributes {stable_mosaic.version = 11 : i64} {
  func.func @_sq_hinge_kernel(%arg0: i32, %arg1: i32, %arg2: memref<1xi32, #tpu.memory_space<smem>>, %arg3: memref<1xf32, #tpu.memory_space<smem>>, %arg4: memref<8x128xf32, #tpu.memory_space<vmem>>, %arg5: memref<2x8x128xf32, #tpu.memory_space<vmem>>, %arg6: memref<1x8x128xf32, #tpu.memory_space<vmem>>) attributes {dimension_semantics = [#tpu.dimension_semantics<parallel>, #tpu.dimension_semantics<arbitrary>], iteration_bounds = array<i64: 1, 1>, scalar_prefetch = 0 : i64, scratch_operands = 0 : i64, tpu.core_type = #tpu.core_type<tc>, window_params = [{transform_indices = @transform_0, window_bounds = array<i64: 1>}, {transform_indices = @transform_1, window_bounds = array<i64: 1>}, {transform_indices = @transform_2, window_bounds = array<i64: 8, 128>}, {transform_indices = @transform_3, window_bounds = array<i64: 2, 8, 128>}, {transform_indices = @transform_4, window_bounds = array<i64: 1, 8, 128>}]} {
    %c0_i32 = arith.constant 0 : i32
    %0 = arith.cmpi eq, %arg1, %c0_i32 : i32
    %1 = arith.extui %0 : i1 to i32
    %c0_i32_0 = arith.constant 0 : i32
    %2 = arith.cmpi ne, %1, %c0_i32_0 : i32
    scf.if %2 {
      %cst_19 = arith.constant 0.000000e+00 : f32
      %53 = vector.broadcast %cst_19 : f32 to vector<1x8x128xf32>
      %c0_20 = arith.constant 0 : index
      %c0_21 = arith.constant 0 : index
      %c0_22 = arith.constant 0 : index
      %54 = vector.load %arg6[%c0_20, %c0_21, %c0_22] : memref<1x8x128xf32, #tpu.memory_space<vmem>>, vector<1x8x128xf32>
      tpu.vector_store %arg6[%c0_20, %c0_21, %c0_22], %53 {strides = array<i32>} : memref<1x8x128xf32, #tpu.memory_space<vmem>>, vector<1x8x128xf32>,
    } else {
    }
    %c0 = arith.constant 0 : index
    %3 = memref.load %arg2[%c0] : memref<1xi32, #tpu.memory_space<smem>>
    %c0_1 = arith.constant 0 : index
    %4 = memref.load %arg3[%c0_1] : memref<1xf32, #tpu.memory_space<smem>>
    %c1_i32 = arith.constant 1 : i32
    %5 = arith.muli %arg0, %c1_i32 : i32
    %6 = arith.addi %5, %arg1 : i32
    %c1024_i32 = arith.constant 1024 : i32
    %7 = arith.muli %6, %c1024_i32 : i32
    %8 = tpu.iota {dimensions = array<i32: 0>} : vector<8x128xi32>
    %c128_i32 = arith.constant 128 : i32
    %9 = vector.broadcast %c128_i32 : i32 to vector<8x128xi32>
    %10 = arith.muli %8, %9 : vector<8x128xi32>
    %11 = tpu.iota {dimensions = array<i32: 1>} : vector<8x128xi32>
    %12 = arith.addi %10, %11 : vector<8x128xi32>
    %cst = arith.constant 0.000000e+00 : f32
    %13 = vector.broadcast %cst : f32 to vector<8x128xf32>
    %c0_i32_2 = arith.constant 0 : i32
    %c8_i32 = arith.constant 8 : i32
    %14 = arith.muli %c0_i32_2, %c8_i32 : i32
    %15 = tpu.assume_multiple %14, 8 : i32
    %16 = arith.index_cast %15 : i32 to index
    %c0_3 = arith.constant 0 : index
    %17 = vector.load %arg4[%16, %c0_3] : memref<8x128xf32, #tpu.memory_space<vmem>>, vector<8x128xf32>
    %c0_4 = arith.constant 0 : index
    %18 = arith.index_cast %15 : i32 to index
    %c0_5 = arith.constant 0 : index
    %19 = vector.load %arg5[%c0_4, %18, %c0_5] : memref<2x8x128xf32, #tpu.memory_space<vmem>>, vector<1x8x128xf32>
    %20 = vector.shape_cast %19 : vector<1x8x128xf32> to vector<8x128xf32>
    %c1 = arith.constant 1 : index
    %21 = arith.index_cast %15 : i32 to index
    %c0_6 = arith.constant 0 : index
    %22 = vector.load %arg5[%c1, %21, %c0_6] : memref<2x8x128xf32, #tpu.memory_space<vmem>>, vector<1x8x128xf32>
    %23 = vector.shape_cast %22 : vector<1x8x128xf32> to vector<8x128xf32>
    %24 = arith.subf %20, %17 : vector<8x128xf32>
    %25 = vector.broadcast %4 : f32 to vector<8x128xf32>
    %26 = arith.addf %24, %25 : vector<8x128xf32>
    %cst_7 = arith.constant 0.000000e+00 : f32
    %27 = vector.broadcast %cst_7 : f32 to vector<8x128xf32>
    %28 = arith.maximumf %26, %27 : vector<8x128xf32>
    %29 = arith.subf %17, %23 : vector<8x128xf32>
    %30 = vector.broadcast %4 : f32 to vector<8x128xf32>
    %31 = arith.addf %29, %30 : vector<8x128xf32>
    %cst_8 = arith.constant 0.000000e+00 : f32
    %32 = vector.broadcast %cst_8 : f32 to vector<8x128xf32>
    %33 = arith.maximumf %31, %32 : vector<8x128xf32>
    %34 = arith.addf %28, %33 : vector<8x128xf32>
    %35 = arith.mulf %34, %34 : vector<8x128xf32>
    %c128_i32_9 = arith.constant 128 : i32
    %36 = arith.muli %15, %c128_i32_9 : i32
    %37 = arith.addi %7, %36 : i32
    %38 = vector.broadcast %37 : i32 to vector<8x128xi32>
    %39 = arith.addi %38, %12 : vector<8x128xi32>
    %40 = vector.broadcast %3 : i32 to vector<8x128xi32>
    %41 = arith.cmpi slt, %39, %40 : vector<8x128xi32>
    %cst_10 = arith.constant 0.000000e+00 : f32
    %42 = vector.broadcast %cst_10 : f32 to vector<8x128xf32>
    %43 = arith.select %41, %35, %42 : vector<8x128xi1>, vector<8x128xf32>
    %44 = vector.shape_cast %43 : vector<8x128xf32> to vector<1x8x128xf32>
    %cst_11 = arith.constant dense<0.000000e+00> : vector<8x128xf32>
    %45 = vector.multi_reduction <add>, %44, %cst_11 [0] : vector<1x8x128xf32> to vector<8x128xf32>
    %46 = arith.addf %13, %45 : vector<8x128xf32>
    %c1_i32_12 = arith.constant 1 : i32
    %c0_13 = arith.constant 0 : index
    %c0_14 = arith.constant 0 : index
    %c0_15 = arith.constant 0 : index
    %47 = vector.load %arg6[%c0_13, %c0_14, %c0_15] : memref<1x8x128xf32, #tpu.memory_space<vmem>>, vector<1x8x128xf32>
    %48 = vector.shape_cast %47 : vector<1x8x128xf32> to vector<8x128xf32>
    %49 = arith.addf %48, %46 : vector<8x128xf32>
    %c0_16 = arith.constant 0 : index
    %c0_17 = arith.constant 0 : index
    %c0_18 = arith.constant 0 : index
    %50 = vector.load %arg6[%c0_16, %c0_17, %c0_18] : memref<1x8x128xf32, #tpu.memory_space<vmem>>, vector<1x8x128xf32>
    %51 = vector.shape_cast %50 : vector<1x8x128xf32> to vector<8x128xf32>
    %52 = vector.shape_cast %49 : vector<8x128xf32> to vector<1x8x128xf32>
    tpu.vector_store %arg6[%c0_16, %c0_17, %c0_18], %52 {strides = array<i32>} : memref<1x8x128xf32, #tpu.memory_space<vmem>>, vector<1x8x128xf32>,
    return
  }
  func.func @transform_0(%arg0: i32, %arg1: i32) -> i32 {
    %c0_i32 = arith.constant 0 : i32
    %c0_i32_0 = arith.constant 0 : i32
    return %c0_i32 : i32
  }
  func.func @transform_1(%arg0: i32, %arg1: i32) -> i32 {
    %c0_i32 = arith.constant 0 : i32
    %c0_i32_0 = arith.constant 0 : i32
    return %c0_i32 : i32
  }
  func.func @transform_2(%arg0: i32, %arg1: i32) -> (i32, i32) {
    %c1_i32 = arith.constant 1 : i32
    %0 = arith.muli %arg0, %c1_i32 : i32
    %1 = arith.addi %0, %arg1 : i32
    %c0_i32 = arith.constant 0 : i32
    %2 = arith.minsi %1, %c0_i32 : i32
    %c0_i32_0 = arith.constant 0 : i32
    %c0_i32_1 = arith.constant 0 : i32
    return %2, %c0_i32_0 : i32, i32
  }
  func.func @transform_3(%arg0: i32, %arg1: i32) -> (i32, i32, i32) {
    %c1_i32 = arith.constant 1 : i32
    %0 = arith.muli %arg0, %c1_i32 : i32
    %1 = arith.addi %0, %arg1 : i32
    %c0_i32 = arith.constant 0 : i32
    %2 = arith.minsi %1, %c0_i32 : i32
    %c0_i32_0 = arith.constant 0 : i32
    %c0_i32_1 = arith.constant 0 : i32
    %c0_i32_2 = arith.constant 0 : i32
    return %c0_i32_0, %2, %c0_i32_1 : i32, i32, i32
  }
  func.func @transform_4(%arg0: i32, %arg1: i32) -> (i32, i32, i32) {
    %c0_i32 = arith.constant 0 : i32
    %c0_i32_0 = arith.constant 0 : i32
    %c0_i32_1 = arith.constant 0 : i32
    return %arg0, %c0_i32, %c0_i32_0 : i32, i32, i32
  }
}

</mosaic_0001>

<bundles_post_ra>
// kernel: squared_hinge_loss.1
= control target key start
LH: loop header
LB: loop body
LE: loop exit
PB: predicated region body
PF: predicated region fallthrough
CT: control target
= control target key end

     0   :  { %v82_v0 = vlaneseq  ;;  %s176_s1 = inlined_call_operand.<no memory space> [shape: f32[1], index: 1, kind: input, shape index: {}]   ;;  %s177_s2 = inlined_call_operand.vmem [shape: f32[8,128], index: 2, kind: input, shape index: {}]   ;;  %s178_s3 = inlined_call_operand.vmem [shape: f32[2,8,128], index: 3, kind: input, shape index: {}]   ;;  %s179_s0 = inlined_call_operand.<no memory space> [shape: s32[1], index: 0, kind: input, shape index: {}]   ;;  %s180_s4 = inlined_call_operand.vmem [shape: f32[1,8,128], index: 4, kind: output, shape index: {}]  }
   0x1   :  { %v88_v1 = vld [vmem:[%s177_s2] sm:$0xff]  ;;  %v131_v3 = vld [vmem:[%s178_s3 + $0x8] sm:$0xff]  ;;  %v94_v4 = vstv %s176_s1  ;;  %v106_v15 = vstv %s179_s0 }
   0x2   :  { %v89_v2 = vld [vmem:[%s178_s3] sm:$0xff]  ;;  %v83_v5 = vshrl.u32 %v82_v0, 7  ;;  %v86_v6 = vand.u32 127, %v82_v0  ;;  %v97_v8 = vsub.f32 %v88_v1, %v131_v3 }
   0x3   :  { %v93_v7 = vsub.f32 %v89_v2, %v88_v1 }
   0x4   :  { %v84_v9 = vmul.u32 128, %v83_v5  ;;  %v98_v11 = vadd.f32 %v97_v8, %v94_v4 }
   0x5   :  { %v95_v10 = vadd.f32 %v94_v4, %v93_v7 }
   0x6   :  { %v87_v12 = vadd.s32 %v86_v6, %v84_v9  ;;  %v99_v14 = vmax.f32 %v98_v11, 0.0 }
   0x7   :  { %v96_v13 = vmax.f32 %v95_v10, 0.0 }
   0x8   :  { %vm107_vm0 = vcmp.lt.s32.totalorder %v87_v12, %v106_v15 }
   0x9   :  { %v100_v16 = vadd.f32 %v99_v14, %v96_v13 }
   0xb   :  { %v101_v17 = vmul.f32 %v100_v16, %v100_v16 }
   0xd   :  { %v108_v18 = vsel %vm107_vm0, %v101_v17, 0.0 }
   0xe   :  { %113 = vst [vmem:[%s180_s4] sm:$0xff] %v108_v18 }

</bundles_post_ra>
